<compile_context>
chip_gen: v5e
topology: v5e:2x2
jax: 0.10.0
libtpu: 0.0.40
codegen_flags: <defaults>
</compile_context>

<pallas_src>
import jax
import jax.numpy as jnp
import numpy as np
from jax.experimental import pallas as pl
from jax.experimental.pallas import tpu as pltpu


def _vmem_limit_bytes():
    """Scoped-VMEM budget: ~half of physical VMEM, capped (v7x only has 64 MiB)."""
    try:
        cap = pltpu.get_tpu_info().vmem_capacity_bytes
        return int(max(32 * 1024 * 1024, min(96 * 1024 * 1024, cap // 2)))
    except Exception:
        return 32 * 1024 * 1024


def _lane_tile(p):
    """Largest 128-multiple tile dividing p (falls back to full extent).

    TODO(synk): pad P up to a multiple of 128 instead of falling back to a
    single <128-lane block when P has no 128-multiple divisor.
    """
    for t in (2048, 1024, 512, 256, 128):
        if p % t == 0:
            return t
    return p


# -----------------------------------------------------------------------------
# Kernel 1: fused (1x1 conv as matmul) + per-row bias + ReLU, NCHW-native.
#   Input viewed as (N, C_in, P) with P = H*W lane-dense; weights bf16, acc f32.
# -----------------------------------------------------------------------------
def _matmul_bias_relu_kernel(x_ref, w_ref, b_ref, o_ref):
    xb = x_ref[...].astype(jnp.bfloat16)                       # (C_in, pt)
    acc = jnp.dot(w_ref[...], xb, preferred_element_type=jnp.float32)
    o_ref[...] = jnp.maximum(acc + b_ref[...], 0.0).astype(o_ref.dtype)


def conv1x1_bn_relu(x3d, w_bf16, bias):
    """relu(w @ x + b) applied per batch image; x3d: (N, C_in, P)."""
    n, cin, p = x3d.shape
    co = w_bf16.shape[0]
    pt = _lane_tile(p)
    return pl.pallas_call(
        _matmul_bias_relu_kernel,
        out_shape=jax.ShapeDtypeStruct((n, co, p), x3d.dtype),
        grid_spec=pltpu.PrefetchScalarGridSpec(
            num_scalar_prefetch=0,
            grid=(n, p // pt),
            in_specs=[
                pl.BlockSpec((None, cin, pt), lambda b, i: (b, 0, i)),
                pl.BlockSpec((co, cin), lambda b, i: (0, 0)),
                pl.BlockSpec((co, 1), lambda b, i: (0, 0)),
            ],
            out_specs=pl.BlockSpec((None, co, pt), lambda b, i: (b, 0, i)),
        ),
        compiler_params=pltpu.CompilerParams(
            dimension_semantics=("parallel", "parallel"),
            vmem_limit_bytes=_vmem_limit_bytes(),
        ),
    )(x3d, w_bf16, bias.reshape(co, 1))


# -----------------------------------------------------------------------------
# Kernel 2: BOTH stride-2 depthwise 3x3 convs in one per-batch kernel,
# formulated as decimation matmuls so there are no strided slices, no phase
# decomposition and no in-kernel reshapes:
#     z[c] = sum_{di=0..2} (A_di @ x[c]) @ B_di[c]
#   A_di[i, h]   = 1  iff h == 2i + di - 1 (zero rows encode the top pad)
#   B_di[c,w,j]  = sum_dj dw[c,di,dj] * [w == 2j + dj - 1]  (folds weights + pad)
# Output z = [dwconv1(x) ; dwconv4(y)] stacked on the channel axis (pre-BN; the
# BNs are folded into the following merged 1x1 matmul).
# -----------------------------------------------------------------------------
def _dual_dwconv_s2_kernel(x_ref, y_ref, a1_ref, b1_ref, a2_ref, b2_ref, z_ref):
    cin = x_ref.shape[0]

    def dwconv(v, a_ref, b_ref):
        acc = None
        for di in range(3):                                    # unrolled, 3 taps
            u = jnp.einsum('cah,chw->caw', a_ref[di], v,
                           preferred_element_type=jnp.float32)  # (C, Ho, W)
            t = jnp.einsum('caw,cwo->cao', u, b_ref[di],
                           preferred_element_type=jnp.float32)  # (C, Ho, Wo)
            acc = t if acc is None else acc + t
        return acc

    z_ref[:cin, :, :] = dwconv(x_ref[...], a1_ref, b1_ref).astype(z_ref.dtype)
    z_ref[cin:, :, :] = dwconv(y_ref[...], a2_ref, b2_ref).astype(z_ref.dtype)


def _decimation_selectors(size_in):
    """S[d, k, j] = 1 iff k == 2*j + d - 1  (stride-2, pad-1 tap selector)."""
    size_out = (size_in + 1) // 2
    d = np.arange(3)[:, None, None]
    k = np.arange(size_in)[None, :, None]
    j = np.arange(size_out)[None, None, :]
    return (k == 2 * j + d - 1).astype(np.float32)             # (3, in, out)


def dual_dwconv3x3_s2(x, y, dw1, dw4):
    """x: (N, Cin, H, W), y: (N, mid, H, W), dw*: (C, 3, 3) -> (N, Cin+mid, Ho, Wo)."""
    n, cin, h, w = x.shape
    mid = y.shape[1]
    ho, wo = (h + 1) // 2, (w + 1) // 2
    ctot = cin + mid

    rows = _decimation_selectors(h).transpose(0, 2, 1)         # (3, Ho, H)
    cols = jnp.asarray(_decimation_selectors(w))               # (3, W, Wo)
    a1 = jnp.broadcast_to(jnp.asarray(rows)[:, None], (3, cin, ho, h))
    a2 = jnp.broadcast_to(jnp.asarray(rows)[:, None], (3, mid, ho, h))
    b1 = jnp.einsum('cde,ewj->dcwj', dw1, cols)                # (3, Cin, W, Wo)
    b2 = jnp.einsum('cde,ewj->dcwj', dw4, cols)                # (3, mid, W, Wo)

    return pl.pallas_call(
        _dual_dwconv_s2_kernel,
        out_shape=jax.ShapeDtypeStruct((n, ctot, ho, wo), x.dtype),
        grid_spec=pltpu.PrefetchScalarGridSpec(
            num_scalar_prefetch=0,
            grid=(n,),
            in_specs=[
                pl.BlockSpec((None, cin, h, w), lambda i: (i, 0, 0, 0)),
                pl.BlockSpec((None, mid, h, w), lambda i: (i, 0, 0, 0)),
                pl.BlockSpec((3, cin, ho, h), lambda i: (0, 0, 0, 0)),
                pl.BlockSpec((3, cin, w, wo), lambda i: (0, 0, 0, 0)),
                pl.BlockSpec((3, mid, ho, h), lambda i: (0, 0, 0, 0)),
                pl.BlockSpec((3, mid, w, wo), lambda i: (0, 0, 0, 0)),
            ],
            out_specs=pl.BlockSpec((None, ctot, ho, wo), lambda i: (i, 0, 0, 0)),
        ),
        compiler_params=pltpu.CompilerParams(
            dimension_semantics=("parallel",),
            vmem_limit_bytes=_vmem_limit_bytes(),
        ),
    )(x, y, a1, b1, a2, b2)


# -----------------------------------------------------------------------------
# DownBlock forward (Pallas path).
# -----------------------------------------------------------------------------
def _bn_fold(gamma, beta, mean, var, eps=1e-5):
    s = gamma * jax.lax.rsqrt(var + eps)
    return s, beta - mean * s


@jax.jit
def downblock_forward(x, params):
    """x: (N, C_in, H, W) NCHW float32. Inference-mode BatchNorm."""
    n, cin, h, w = x.shape
    mid = params["w2"].shape[0]
    ho, wo = (h + 1) // 2, (w + 1) // 2

    s1, c1 = _bn_fold(*params["bn1"])
    s2, c2 = _bn_fold(*params["bn2"])
    s3, c3 = _bn_fold(*params["bn3"])
    s4, c4 = _bn_fold(*params["bn4"])
    s5, c5 = _bn_fold(*params["bn5"])

    w2 = params["w2"].reshape(mid, cin)
    w3 = params["w3"].reshape(mid, cin)
    w5 = params["w5"].reshape(mid, mid)
    dw1 = params["w1"].reshape(cin, 3, 3)
    dw4 = params["w4"].reshape(mid, 3, 3)

    # ---- branch-2 head: relu(bn3(conv3_1x1(x))), NCHW-native, bf16 operands ----
    a3 = (w3 * s3[:, None]).astype(jnp.bfloat16)
    y2d = conv1x1_bn_relu(x.reshape(n, cin, h * w), a3, c3)      # (N, mid, H*W)
    y = y2d.reshape(n, mid, h, w)                                # metadata-only

    # ---- both stride-2 depthwise convs in one fused kernel (pre-BN outputs) ----
    z = dual_dwconv3x3_s2(x, y, dw1, dw4)                        # (N, Cin+mid, Ho, Wo)

    # ---- merged branch tails + concat + groups=2 channel shuffle ----
    # branch1: relu(bn2(W2 bn1(z1)))  -> even output rows
    # branch2: relu(bn5(W5 bn4(z2)))  -> odd  output rows
    a1 = w2 * s1[None, :] * s2[:, None]
    b1 = s2 * (w2 @ c1) + c2
    a2 = w5 * s4[None, :] * s5[:, None]
    b2 = s5 * (w5 @ c4) + c5

    am = jnp.zeros((2 * mid, cin + mid), jnp.float32)
    am = am.at[0::2, :cin].set(a1).at[1::2, cin:].set(a2)        # shuffle in rows
    am = am.astype(jnp.bfloat16)
    bias = jnp.zeros((2 * mid,), jnp.float32).at[0::2].set(b1).at[1::2].set(b2)

    out2d = conv1x1_bn_relu(z.reshape(n, cin + mid, ho * wo), am, bias)
    return out2d.reshape(n, 2 * mid, ho, wo)                     # metadata-only


# -----------------------------------------------------------------------------
# Pure-JAX reference (mirrors the PyTorch forward op-by-op) for validation.
# -----------------------------------------------------------------------------
def _conv2d_ref(x, w, stride, padding, groups):
    return jax.lax.conv_general_dilated(
        x, w, window_strides=(stride, stride),
        padding=((padding, padding), (padding, padding)),
        dimension_numbers=("NCHW", "OIHW", "NCHW"),
        feature_group_count=groups,
        precision=jax.lax.Precision.HIGHEST)


def _bn_ref(x, gamma, beta, mean, var, eps=1e-5):
    s = gamma / jnp.sqrt(var + eps)
    return x * s[None, :, None, None] + (beta - mean * s)[None, :, None, None]


def downblock_reference(x, params):
    cin = x.shape[1]
    mid = params["w2"].shape[0]
    o1 = _bn_ref(_conv2d_ref(x, params["w1"], 2, 1, cin), *params["bn1"])
    o1 = jax.nn.relu(_bn_ref(_conv2d_ref(o1, params["w2"], 1, 0, 1), *params["bn2"]))
    o2 = jax.nn.relu(_bn_ref(_conv2d_ref(x, params["w3"], 1, 0, 1), *params["bn3"]))
    o2 = _bn_ref(_conv2d_ref(o2, params["w4"], 2, 1, mid), *params["bn4"])
    o2 = jax.nn.relu(_bn_ref(_conv2d_ref(o2, params["w5"], 1, 0, 1), *params["bn5"]))
    out = jnp.concatenate([o1, o2], axis=1)
    n, c, hh, ww = out.shape
    return out.reshape(n, 2, c // 2, hh, ww).transpose(0, 2, 1, 3, 4).reshape(n, c, hh, ww)


if __name__ == "__main__":
    key = jax.random.PRNGKey(0)
    n, cin, h, w = 2, 4, 16, 16
    cout = 8
    mid = cout // 2

    keys = jax.random.split(key, 11)

    def bn_params(k, c):
        k1, k2, k3, k4 = jax.random.split(k, 4)
        gamma = jax.random.uniform(k1, (c,), jnp.float32, 0.5, 1.5)
        beta = 0.1 * jax.random.normal(k2, (c,), jnp.float32)
        mean = 0.1 * jax.random.normal(k3, (c,), jnp.float32)
        var = jax.random.uniform(k4, (c,), jnp.float32, 0.5, 1.5)
        return gamma, beta, mean, var

    x = jax.random.normal(keys[0], (n, cin, h, w), jnp.float32)
    params = {
        "w1": 0.3 * jax.random.normal(keys[1], (cin, 1, 3, 3), jnp.float32),
        "w2": 0.3 * jax.random.normal(keys[2], (mid, cin, 1, 1), jnp.float32),
        "w3": 0.3 * jax.random.normal(keys[3], (mid, cin, 1, 1), jnp.float32),
        "w4": 0.3 * jax.random.normal(keys[4], (mid, 1, 3, 3), jnp.float32),
        "w5": 0.3 * jax.random.normal(keys[5], (mid, mid, 1, 1), jnp.float32),
        "bn1": bn_params(keys[6], cin),
        "bn2": bn_params(keys[7], mid),
        "bn3": bn_params(keys[8], mid),
        "bn4": bn_params(keys[9], mid),
        "bn5": bn_params(keys[10], mid),
    }

    out = jax.block_until_ready(downblock_forward(x, params))
    ref = jax.block_until_ready(downblock_reference(x, params))

    assert out.shape == ref.shape == (n, cout, h // 2, w // 2), (out.shape, ref.shape)
    # bf16 MXU operands (f32 accumulation) -> slightly relaxed tolerance vs. the
    # HIGHEST-precision f32 reference.
    max_err = float(jnp.max(jnp.abs(out - ref)))
    assert jnp.allclose(out, ref, atol=3e-2, rtol=5e-2), max_err

    print("KERNEL_OK")
</pallas_src>

<mosaic_0001>
module attributes {stable_mosaic.version = 11 : i64} {
  func.func @_matmul_bias_relu_kernel(%arg0: i32, %arg1: i32, %arg2: memref<1x4x256xf32, #tpu.memory_space<vmem>>, %arg3: memref<4x4xbf16, #tpu.memory_space<vmem>>, %arg4: memref<4x1xf32, #tpu.memory_space<vmem>>, %arg5: memref<1x4x256xf32, #tpu.memory_space<vmem>>) attributes {dimension_semantics = [#tpu.dimension_semantics<parallel>, #tpu.dimension_semantics<parallel>], iteration_bounds = array<i64: 2, 1>, scalar_prefetch = 0 : i64, scratch_operands = 0 : i64, tpu.core_type = #tpu.core_type<tc>, window_params = [{transform_indices = @transform_0, window_bounds = array<i64: 1, 4, 256>}, {pipeline_mode = #tpu.pipeline_mode<synchronous>, transform_indices = @transform_1, window_bounds = array<i64: 4, 4>}, {pipeline_mode = #tpu.pipeline_mode<synchronous>, transform_indices = @transform_2, window_bounds = array<i64: 4, 1>}, {transform_indices = @transform_3, window_bounds = array<i64: 1, 4, 256>}]} {
    %c0 = arith.constant 0 : index
    %c0_0 = arith.constant 0 : index
    %c0_1 = arith.constant 0 : index
    %0 = vector.load %arg2[%c0, %c0_0, %c0_1] : memref<1x4x256xf32, #tpu.memory_space<vmem>>, vector<1x4x256xf32>
    %1 = vector.shape_cast %0 : vector<1x4x256xf32> to vector<4x256xf32>
    %2 = arith.truncf %1 : vector<4x256xf32> to vector<4x256xbf16>
    %c0_2 = arith.constant 0 : index
    %c0_3 = arith.constant 0 : index
    %3 = vector.load %arg3[%c0_2, %c0_3] : memref<4x4xbf16, #tpu.memory_space<vmem>>, vector<4x4xbf16>
    %cst = arith.constant dense<0.000000e+00> : vector<4x256xf32>
    %4 = tpu.matmul %3, %2, %cst {dimension_numbers = #tpu.dot_dimension_numbers<[1], [0], [0], [1], [0, 0, 1, 1], [], []>} : vector<4x4xbf16>, vector<4x256xbf16>, vector<4x256xf32> -> vector<4x256xf32>
    %c0_4 = arith.constant 0 : index
    %c0_5 = arith.constant 0 : index
    %5 = vector.load %arg4[%c0_4, %c0_5] : memref<4x1xf32, #tpu.memory_space<vmem>>, vector<4x1xf32>
    %6 = vector.broadcast %5 : vector<4x1xf32> to vector<4x256xf32>
    %7 = arith.addf %4, %6 : vector<4x256xf32>
    %cst_6 = arith.constant 0.000000e+00 : f32
    %8 = vector.broadcast %cst_6 : f32 to vector<4x256xf32>
    %9 = arith.maximumf %7, %8 : vector<4x256xf32>
    %c0_7 = arith.constant 0 : index
    %c0_8 = arith.constant 0 : index
    %c0_9 = arith.constant 0 : index
    %10 = vector.load %arg5[%c0_7, %c0_8, %c0_9] : memref<1x4x256xf32, #tpu.memory_space<vmem>>, vector<1x4x256xf32>
    %11 = vector.shape_cast %10 : vector<1x4x256xf32> to vector<4x256xf32>
    %12 = vector.shape_cast %9 : vector<4x256xf32> to vector<1x4x256xf32>
    tpu.vector_store %arg5[%c0_7, %c0_8, %c0_9], %12 {strides = array<i32>} : memref<1x4x256xf32, #tpu.memory_space<vmem>>, vector<1x4x256xf32>,
    return
  }
  func.func @transform_0(%arg0: i32, %arg1: i32) -> (i32, i32, i32) {
    %c0_i32 = arith.constant 0 : i32
    %c0_i32_0 = arith.constant 0 : i32
    return %arg0, %c0_i32, %arg1 : i32, i32, i32
  }
  func.func @transform_1(%arg0: i32, %arg1: i32) -> (i32, i32) {
    %c0_i32 = arith.constant 0 : i32
    %c0_i32_0 = arith.constant 0 : i32
    %c0_i32_1 = arith.constant 0 : i32
    return %c0_i32, %c0_i32_0 : i32, i32
  }
  func.func @transform_2(%arg0: i32, %arg1: i32) -> (i32, i32) {
    %c0_i32 = arith.constant 0 : i32
    %c0_i32_0 = arith.constant 0 : i32
    %c0_i32_1 = arith.constant 0 : i32
    return %c0_i32, %c0_i32_0 : i32, i32
  }
  func.func @transform_3(%arg0: i32, %arg1: i32) -> (i32, i32, i32) {
    %c0_i32 = arith.constant 0 : i32
    %c0_i32_0 = arith.constant 0 : i32
    return %arg0, %c0_i32, %arg1 : i32, i32, i32
  }
}

module attributes {stable_mosaic.version = 11 : i64} {
  func.func @_dual_dwconv_s2_kernel(%arg0: i32, %arg1: memref<1x4x16x16xf32, #tpu.memory_space<vmem>>, %arg2: memref<1x4x16x16xf32, #tpu.memory_space<vmem>>, %arg3: memref<3x4x8x16xf32, #tpu.memory_space<vmem>>, %arg4: memref<3x4x16x8xf32, #tpu.memory_space<vmem>>, %arg5: memref<3x4x8x16xf32, #tpu.memory_space<vmem>>, %arg6: memref<3x4x16x8xf32, #tpu.memory_space<vmem>>, %arg7: memref<1x8x8x8xf32, #tpu.memory_space<vmem>>) attributes {dimension_semantics = [#tpu.dimension_semantics<parallel>], iteration_bounds = array<i64: 2>, scalar_prefetch = 0 : i64, scratch_operands = 0 : i64, tpu.core_type = #tpu.core_type<tc>, window_params = [{transform_indices = @transform_0, window_bounds = array<i64: 1, 4, 16, 16>}, {transform_indices = @transform_1, window_bounds = array<i64: 1, 4, 16, 16>}, {pipeline_mode = #tpu.pipeline_mode<synchronous>, transform_indices = @transform_2, window_bounds = array<i64: 3, 4, 8, 16>}, {pipeline_mode = #tpu.pipeline_mode<synchronous>, transform_indices = @transform_3, window_bounds = array<i64: 3, 4, 16, 8>}, {pipeline_mode = #tpu.pipeline_mode<synchronous>, transform_indices = @transform_4, window_bounds = array<i64: 3, 4, 8, 16>}, {pipeline_mode = #tpu.pipeline_mode<synchronous>, transform_indices = @transform_5, window_bounds = array<i64: 3, 4, 16, 8>}, {transform_indices = @transform_6, window_bounds = array<i64: 1, 8, 8, 8>}]} {
    %c0 = arith.constant 0 : index
    %c0_0 = arith.constant 0 : index
    %c0_1 = arith.constant 0 : index
    %c0_2 = arith.constant 0 : index
    %0 = vector.load %arg1[%c0, %c0_0, %c0_1, %c0_2] : memref<1x4x16x16xf32, #tpu.memory_space<vmem>>, vector<1x4x16x16xf32>
    %1 = vector.shape_cast %0 : vector<1x4x16x16xf32> to vector<4x16x16xf32>
    %c0_3 = arith.constant 0 : index
    %c0_4 = arith.constant 0 : index
    %c0_5 = arith.constant 0 : index
    %c0_6 = arith.constant 0 : index
    %2 = vector.load %arg3[%c0_3, %c0_4, %c0_5, %c0_6] : memref<3x4x8x16xf32, #tpu.memory_space<vmem>>, vector<1x4x8x16xf32>
    %3 = vector.shape_cast %2 : vector<1x4x8x16xf32> to vector<4x8x16xf32>
    "tpu.trace_start"() <{level = 10 : i32, message = "cah,chw->caw"}> : () -> ()
    %cst = arith.constant dense<0.000000e+00> : vector<4x8x16xf32>
    %4 = tpu.matmul %3, %1, %cst {dimension_numbers = #tpu.dot_dimension_numbers<[2], [1], [1], [2], [0, 0, 0, 1, 1, 2], [0], [0]>} : vector<4x8x16xf32>, vector<4x16x16xf32>, vector<4x8x16xf32> -> vector<4x8x16xf32>
    "tpu.trace_stop"() : () -> ()
    %c0_7 = arith.constant 0 : index
    %c0_8 = arith.constant 0 : index
    %c0_9 = arith.constant 0 : index
    %c0_10 = arith.constant 0 : index
    %5 = vector.load %arg4[%c0_7, %c0_8, %c0_9, %c0_10] : memref<3x4x16x8xf32, #tpu.memory_space<vmem>>, vector<1x4x16x8xf32>
    %6 = vector.shape_cast %5 : vector<1x4x16x8xf32> to vector<4x16x8xf32>
    "tpu.trace_start"() <{level = 10 : i32, message = "caw,cwo->cao"}> : () -> ()
    %cst_11 = arith.constant dense<0.000000e+00> : vector<4x8x8xf32>
    %7 = tpu.matmul %4, %6, %cst_11 {dimension_numbers = #tpu.dot_dimension_numbers<[2], [1], [1], [2], [0, 0, 0, 1, 1, 2], [0], [0]>} : vector<4x8x16xf32>, vector<4x16x8xf32>, vector<4x8x8xf32> -> vector<4x8x8xf32>
    "tpu.trace_stop"() : () -> ()
    %c1 = arith.constant 1 : index
    %c0_12 = arith.constant 0 : index
    %c0_13 = arith.constant 0 : index
    %c0_14 = arith.constant 0 : index
    %8 = vector.load %arg3[%c1, %c0_12, %c0_13, %c0_14] : memref<3x4x8x16xf32, #tpu.memory_space<vmem>>, vector<1x4x8x16xf32>
    %9 = vector.shape_cast %8 : vector<1x4x8x16xf32> to vector<4x8x16xf32>
    "tpu.trace_start"() <{level = 10 : i32, message = "cah,chw->caw"}> : () -> ()
    %cst_15 = arith.constant dense<0.000000e+00> : vector<4x8x16xf32>
    %10 = tpu.matmul %9, %1, %cst_15 {dimension_numbers = #tpu.dot_dimension_numbers<[2], [1], [1], [2], [0, 0, 0, 1, 1, 2], [0], [0]>} : vector<4x8x16xf32>, vector<4x16x16xf32>, vector<4x8x16xf32> -> vector<4x8x16xf32>
    "tpu.trace_stop"() : () -> ()
    %c1_16 = arith.constant 1 : index
    %c0_17 = arith.constant 0 : index
    %c0_18 = arith.constant 0 : index
    %c0_19 = arith.constant 0 : index
    %11 = vector.load %arg4[%c1_16, %c0_17, %c0_18, %c0_19] : memref<3x4x16x8xf32, #tpu.memory_space<vmem>>, vector<1x4x16x8xf32>
    %12 = vector.shape_cast %11 : vector<1x4x16x8xf32> to vector<4x16x8xf32>
    "tpu.trace_start"() <{level = 10 : i32, message = "caw,cwo->cao"}> : () -> ()
    %cst_20 = arith.constant dense<0.000000e+00> : vector<4x8x8xf32>
    %13 = tpu.matmul %10, %12, %cst_20 {dimension_numbers = #tpu.dot_dimension_numbers<[2], [1], [1], [2], [0, 0, 0, 1, 1, 2], [0], [0]>} : vector<4x8x16xf32>, vector<4x16x8xf32>, vector<4x8x8xf32> -> vector<4x8x8xf32>
    "tpu.trace_stop"() : () -> ()
    %14 = arith.addf %7, %13 : vector<4x8x8xf32>
    %c2 = arith.constant 2 : index
    %c0_21 = arith.constant 0 : index
    %c0_22 = arith.constant 0 : index
    %c0_23 = arith.constant 0 : index
    %15 = vector.load %arg3[%c2, %c0_21, %c0_22, %c0_23] : memref<3x4x8x16xf32, #tpu.memory_space<vmem>>, vector<1x4x8x16xf32>
    %16 = vector.shape_cast %15 : vector<1x4x8x16xf32> to vector<4x8x16xf32>
    "tpu.trace_start"() <{level = 10 : i32, message = "cah,chw->caw"}> : () -> ()
    %cst_24 = arith.constant dense<0.000000e+00> : vector<4x8x16xf32>
    %17 = tpu.matmul %16, %1, %cst_24 {dimension_numbers = #tpu.dot_dimension_numbers<[2], [1], [1], [2], [0, 0, 0, 1, 1, 2], [0], [0]>} : vector<4x8x16xf32>, vector<4x16x16xf32>, vector<4x8x16xf32> -> vector<4x8x16xf32>
    "tpu.trace_stop"() : () -> ()
    %c2_25 = arith.constant 2 : index
    %c0_26 = arith.constant 0 : index
    %c0_27 = arith.constant 0 : index
    %c0_28 = arith.constant 0 : index
    %18 = vector.load %arg4[%c2_25, %c0_26, %c0_27, %c0_28] : memref<3x4x16x8xf32, #tpu.memory_space<vmem>>, vector<1x4x16x8xf32>
    %19 = vector.shape_cast %18 : vector<1x4x16x8xf32> to vector<4x16x8xf32>
    "tpu.trace_start"() <{level = 10 : i32, message = "caw,cwo->cao"}> : () -> ()
    %cst_29 = arith.constant dense<0.000000e+00> : vector<4x8x8xf32>
    %20 = tpu.matmul %17, %19, %cst_29 {dimension_numbers = #tpu.dot_dimension_numbers<[2], [1], [1], [2], [0, 0, 0, 1, 1, 2], [0], [0]>} : vector<4x8x16xf32>, vector<4x16x8xf32>, vector<4x8x8xf32> -> vector<4x8x8xf32>
    "tpu.trace_stop"() : () -> ()
    %21 = arith.addf %14, %20 : vector<4x8x8xf32>
    %c0_30 = arith.constant 0 : index
    %c0_31 = arith.constant 0 : index
    %c0_32 = arith.constant 0 : index
    %c0_33 = arith.constant 0 : index
    %22 = vector.load %arg7[%c0_30, %c0_31, %c0_32, %c0_33] : memref<1x8x8x8xf32, #tpu.memory_space<vmem>>, vector<1x4x8x8xf32>
    %23 = vector.shape_cast %22 : vector<1x4x8x8xf32> to vector<4x8x8xf32>
    %24 = vector.shape_cast %21 : vector<4x8x8xf32> to vector<1x4x8x8xf32>
    tpu.vector_store %arg7[%c0_30, %c0_31, %c0_32, %c0_33], %24 {strides = array<i32>} : memref<1x8x8x8xf32, #tpu.memory_space<vmem>>, vector<1x4x8x8xf32>,
    %c0_34 = arith.constant 0 : index
    %c0_35 = arith.constant 0 : index
    %c0_36 = arith.constant 0 : index
    %c0_37 = arith.constant 0 : index
    %25 = vector.load %arg2[%c0_34, %c0_35, %c0_36, %c0_37] : memref<1x4x16x16xf32, #tpu.memory_space<vmem>>, vector<1x4x16x16xf32>
    %26 = vector.shape_cast %25 : vector<1x4x16x16xf32> to vector<4x16x16xf32>
    %c0_38 = arith.constant 0 : index
    %c0_39 = arith.constant 0 : index
    %c0_40 = arith.constant 0 : index
    %c0_41 = arith.constant 0 : index
    %27 = vector.load %arg5[%c0_38, %c0_39, %c0_40, %c0_41] : memref<3x4x8x16xf32, #tpu.memory_space<vmem>>, vector<1x4x8x16xf32>
    %28 = vector.shape_cast %27 : vector<1x4x8x16xf32> to vector<4x8x16xf32>
    "tpu.trace_start"() <{level = 10 : i32, message = "cah,chw->caw"}> : () -> ()
    %cst_42 = arith.constant dense<0.000000e+00> : vector<4x8x16xf32>
    %29 = tpu.matmul %28, %26, %cst_42 {dimension_numbers = #tpu.dot_dimension_numbers<[2], [1], [1], [2], [0, 0, 0, 1, 1, 2], [0], [0]>} : vector<4x8x16xf32>, vector<4x16x16xf32>, vector<4x8x16xf32> -> vector<4x8x16xf32>
    "tpu.trace_stop"() : () -> ()
    %c0_43 = arith.constant 0 : index
    %c0_44 = arith.constant 0 : index
    %c0_45 = arith.constant 0 : index
    %c0_46 = arith.constant 0 : index
    %30 = vector.load %arg6[%c0_43, %c0_44, %c0_45, %c0_46] : memref<3x4x16x8xf32, #tpu.memory_space<vmem>>, vector<1x4x16x8xf32>
    %31 = vector.shape_cast %30 : vector<1x4x16x8xf32> to vector<4x16x8xf32>
    "tpu.trace_start"() <{level = 10 : i32, message = "caw,cwo->cao"}> : () -> ()
    %cst_47 = arith.constant dense<0.000000e+00> : vector<4x8x8xf32>
    %32 = tpu.matmul %29, %31, %cst_47 {dimension_numbers = #tpu.dot_dimension_numbers<[2], [1], [1], [2], [0, 0, 0, 1, 1, 2], [0], [0]>} : vector<4x8x16xf32>, vector<4x16x8xf32>, vector<4x8x8xf32> -> vector<4x8x8xf32>
    "tpu.trace_stop"() : () -> ()
    %c1_48 = arith.constant 1 : index
    %c0_49 = arith.constant 0 : index
    %c0_50 = arith.constant 0 : index
    %c0_51 = arith.constant 0 : index
    %33 = vector.load %arg5[%c1_48, %c0_49, %c0_50, %c0_51] : memref<3x4x8x16xf32, #tpu.memory_space<vmem>>, vector<1x4x8x16xf32>
    %34 = vector.shape_cast %33 : vector<1x4x8x16xf32> to vector<4x8x16xf32>
    "tpu.trace_start"() <{level = 10 : i32, message = "cah,chw->caw"}> : () -> ()
    %cst_52 = arith.constant dense<0.000000e+00> : vector<4x8x16xf32>
    %35 = tpu.matmul %34, %26, %cst_52 {dimension_numbers = #tpu.dot_dimension_numbers<[2], [1], [1], [2], [0, 0, 0, 1, 1, 2], [0], [0]>} : vector<4x8x16xf32>, vector<4x16x16xf32>, vector<4x8x16xf32> -> vector<4x8x16xf32>
    "tpu.trace_stop"() : () -> ()
    %c1_53 = arith.constant 1 : index
    %c0_54 = arith.constant 0 : index
    %c0_55 = arith.constant 0 : index
    %c0_56 = arith.constant 0 : index
    %36 = vector.load %arg6[%c1_53, %c0_54, %c0_55, %c0_56] : memref<3x4x16x8xf32, #tpu.memory_space<vmem>>, vector<1x4x16x8xf32>
    %37 = vector.shape_cast %36 : vector<1x4x16x8xf32> to vector<4x16x8xf32>
    "tpu.trace_start"() <{level = 10 : i32, message = "caw,cwo->cao"}> : () -> ()
    %cst_57 = arith.constant dense<0.000000e+00> : vector<4x8x8xf32>
    %38 = tpu.matmul %35, %37, %cst_57 {dimension_numbers = #tpu.dot_dimension_numbers<[2], [1], [1], [2], [0, 0, 0, 1, 1, 2], [0], [0]>} : vector<4x8x16xf32>, vector<4x16x8xf32>, vector<4x8x8xf32> -> vector<4x8x8xf32>
    "tpu.trace_stop"() : () -> ()
    %39 = arith.addf %32, %38 : vector<4x8x8xf32>
    %c2_58 = arith.constant 2 : index
    %c0_59 = arith.constant 0 : index
    %c0_60 = arith.constant 0 : index
    %c0_61 = arith.constant 0 : index
    %40 = vector.load %arg5[%c2_58, %c0_59, %c0_60, %c0_61] : memref<3x4x8x16xf32, #tpu.memory_space<vmem>>, vector<1x4x8x16xf32>
    %41 = vector.shape_cast %40 : vector<1x4x8x16xf32> to vector<4x8x16xf32>
    "tpu.trace_start"() <{level = 10 : i32, message = "cah,chw->caw"}> : () -> ()
    %cst_62 = arith.constant dense<0.000000e+00> : vector<4x8x16xf32>
    %42 = tpu.matmul %41, %26, %cst_62 {dimension_numbers = #tpu.dot_dimension_numbers<[2], [1], [1], [2], [0, 0, 0, 1, 1, 2], [0], [0]>} : vector<4x8x16xf32>, vector<4x16x16xf32>, vector<4x8x16xf32> -> vector<4x8x16xf32>
    "tpu.trace_stop"() : () -> ()
    %c2_63 = arith.constant 2 : index
    %c0_64 = arith.constant 0 : index
    %c0_65 = arith.constant 0 : index
    %c0_66 = arith.constant 0 : index
    %43 = vector.load %arg6[%c2_63, %c0_64, %c0_65, %c0_66] : memref<3x4x16x8xf32, #tpu.memory_space<vmem>>, vector<1x4x16x8xf32>
    %44 = vector.shape_cast %43 : vector<1x4x16x8xf32> to vector<4x16x8xf32>
    "tpu.trace_start"() <{level = 10 : i32, message = "caw,cwo->cao"}> : () -> ()
    %cst_67 = arith.constant dense<0.000000e+00> : vector<4x8x8xf32>
    %45 = tpu.matmul %42, %44, %cst_67 {dimension_numbers = #tpu.dot_dimension_numbers<[2], [1], [1], [2], [0, 0, 0, 1, 1, 2], [0], [0]>} : vector<4x8x16xf32>, vector<4x16x8xf32>, vector<4x8x8xf32> -> vector<4x8x8xf32>
    "tpu.trace_stop"() : () -> ()
    %46 = arith.addf %39, %45 : vector<4x8x8xf32>
    %c0_68 = arith.constant 0 : index
    %c4 = arith.constant 4 : index
    %c0_69 = arith.constant 0 : index
    %c0_70 = arith.constant 0 : index
    %47 = vector.load %arg7[%c0_68, %c4, %c0_69, %c0_70] : memref<1x8x8x8xf32, #tpu.memory_space<vmem>>, vector<1x4x8x8xf32>
    %48 = vector.shape_cast %47 : vector<1x4x8x8xf32> to vector<4x8x8xf32>
    %49 = vector.shape_cast %46 : vector<4x8x8xf32> to vector<1x4x8x8xf32>
    tpu.vector_store %arg7[%c0_68, %c4, %c0_69, %c0_70], %49 {strides = array<i32>} : memref<1x8x8x8xf32, #tpu.memory_space<vmem>>, vector<1x4x8x8xf32>,
    return
  }
  func.func @transform_0(%arg0: i32) -> (i32, i32, i32, i32) {
    %c0_i32 = arith.constant 0 : i32
    %c0_i32_0 = arith.constant 0 : i32
    %c0_i32_1 = arith.constant 0 : i32
    %c0_i32_2 = arith.constant 0 : i32
    return %arg0, %c0_i32, %c0_i32_0, %c0_i32_1 : i32, i32, i32, i32
  }
  func.func @transform_1(%arg0: i32) -> (i32, i32, i32, i32) {
    %c0_i32 = arith.constant 0 : i32
    %c0_i32_0 = arith.constant 0 : i32
    %c0_i32_1 = arith.constant 0 : i32
    %c0_i32_2 = arith.constant 0 : i32
    return %arg0, %c0_i32, %c0_i32_0, %c0_i32_1 : i32, i32, i32, i32
  }
  func.func @transform_2(%arg0: i32) -> (i32, i32, i32, i32) {
    %c0_i32 = arith.constant 0 : i32
    %c0_i32_0 = arith.constant 0 : i32
    %c0_i32_1 = arith.constant 0 : i32
    %c0_i32_2 = arith.constant 0 : i32
    %c0_i32_3 = arith.constant 0 : i32
    return %c0_i32, %c0_i32_0, %c0_i32_1, %c0_i32_2 : i32, i32, i32, i32
  }
  func.func @transform_3(%arg0: i32) -> (i32, i32, i32, i32) {
    %c0_i32 = arith.constant 0 : i32
    %c0_i32_0 = arith.constant 0 : i32
    %c0_i32_1 = arith.constant 0 : i32
    %c0_i32_2 = arith.constant 0 : i32
    %c0_i32_3 = arith.constant 0 : i32
    return %c0_i32, %c0_i32_0, %c0_i32_1, %c0_i32_2 : i32, i32, i32, i32
  }
  func.func @transform_4(%arg0: i32) -> (i32, i32, i32, i32) {
    %c0_i32 = arith.constant 0 : i32
    %c0_i32_0 = arith.constant 0 : i32
    %c0_i32_1 = arith.constant 0 : i32
    %c0_i32_2 = arith.constant 0 : i32
    %c0_i32_3 = arith.constant 0 : i32
    return %c0_i32, %c0_i32_0, %c0_i32_1, %c0_i32_2 : i32, i32, i32, i32
  }
  func.func @transform_5(%arg0: i32) -> (i32, i32, i32, i32) {
    %c0_i32 = arith.constant 0 : i32
    %c0_i32_0 = arith.constant 0 : i32
    %c0_i32_1 = arith.constant 0 : i32
    %c0_i32_2 = arith.constant 0 : i32
    %c0_i32_3 = arith.constant 0 : i32
    return %c0_i32, %c0_i32_0, %c0_i32_1, %c0_i32_2 : i32, i32, i32, i32
  }
  func.func @transform_6(%arg0: i32) -> (i32, i32, i32, i32) {
    %c0_i32 = arith.constant 0 : i32
    %c0_i32_0 = arith.constant 0 : i32
    %c0_i32_1 = arith.constant 0 : i32
    %c0_i32_2 = arith.constant 0 : i32
    return %arg0, %c0_i32, %c0_i32_0, %c0_i32_1 : i32, i32, i32, i32
  }
}

module attributes {stable_mosaic.version = 11 : i64} {
  func.func @_matmul_bias_relu_kernel(%arg0: i32, %arg1: i32, %arg2: memref<1x8x64xf32, #tpu.memory_space<vmem>>, %arg3: memref<8x8xbf16, #tpu.memory_space<vmem>>, %arg4: memref<8x1xf32, #tpu.memory_space<vmem>>, %arg5: memref<1x8x64xf32, #tpu.memory_space<vmem>>) attributes {dimension_semantics = [#tpu.dimension_semantics<parallel>, #tpu.dimension_semantics<parallel>], iteration_bounds = array<i64: 2, 1>, scalar_prefetch = 0 : i64, scratch_operands = 0 : i64, tpu.core_type = #tpu.core_type<tc>, window_params = [{transform_indices = @transform_0, window_bounds = array<i64: 1, 8, 64>}, {pipeline_mode = #tpu.pipeline_mode<synchronous>, transform_indices = @transform_1, window_bounds = array<i64: 8, 8>}, {pipeline_mode = #tpu.pipeline_mode<synchronous>, transform_indices = @transform_2, window_bounds = array<i64: 8, 1>}, {transform_indices = @transform_3, window_bounds = array<i64: 1, 8, 64>}]} {
    %c0 = arith.constant 0 : index
    %c0_0 = arith.constant 0 : index
    %c0_1 = arith.constant 0 : index
    %0 = vector.load %arg2[%c0, %c0_0, %c0_1] : memref<1x8x64xf32, #tpu.memory_space<vmem>>, vector<1x8x64xf32>
    %1 = vector.shape_cast %0 : vector<1x8x64xf32> to vector<8x64xf32>
    %2 = arith.truncf %1 : vector<8x64xf32> to vector<8x64xbf16>
    %c0_2 = arith.constant 0 : index
    %c0_3 = arith.constant 0 : index
    %3 = vector.load %arg3[%c0_2, %c0_3] : memref<8x8xbf16, #tpu.memory_space<vmem>>, vector<8x8xbf16>
    %cst = arith.constant dense<0.000000e+00> : vector<8x64xf32>
    %4 = tpu.matmul %3, %2, %cst {dimension_numbers = #tpu.dot_dimension_numbers<[1], [0], [0], [1], [0, 0, 1, 1], [], []>} : vector<8x8xbf16>, vector<8x64xbf16>, vector<8x64xf32> -> vector<8x64xf32>
    %c0_4 = arith.constant 0 : index
    %c0_5 = arith.constant 0 : index
    %5 = vector.load %arg4[%c0_4, %c0_5] : memref<8x1xf32, #tpu.memory_space<vmem>>, vector<8x1xf32>
    %6 = vector.broadcast %5 : vector<8x1xf32> to vector<8x64xf32>
    %7 = arith.addf %4, %6 : vector<8x64xf32>
    %cst_6 = arith.constant 0.000000e+00 : f32
    %8 = vector.broadcast %cst_6 : f32 to vector<8x64xf32>
    %9 = arith.maximumf %7, %8 : vector<8x64xf32>
    %c0_7 = arith.constant 0 : index
    %c0_8 = arith.constant 0 : index
    %c0_9 = arith.constant 0 : index
    %10 = vector.load %arg5[%c0_7, %c0_8, %c0_9] : memref<1x8x64xf32, #tpu.memory_space<vmem>>, vector<1x8x64xf32>
    %11 = vector.shape_cast %10 : vector<1x8x64xf32> to vector<8x64xf32>
    %12 = vector.shape_cast %9 : vector<8x64xf32> to vector<1x8x64xf32>
    tpu.vector_store %arg5[%c0_7, %c0_8, %c0_9], %12 {strides = array<i32>} : memref<1x8x64xf32, #tpu.memory_space<vmem>>, vector<1x8x64xf32>,
    return
  }
  func.func @transform_0(%arg0: i32, %arg1: i32) -> (i32, i32, i32) {
    %c0_i32 = arith.constant 0 : i32
    %c0_i32_0 = arith.constant 0 : i32
    return %arg0, %c0_i32, %arg1 : i32, i32, i32
  }
  func.func @transform_1(%arg0: i32, %arg1: i32) -> (i32, i32) {
    %c0_i32 = arith.constant 0 : i32
    %c0_i32_0 = arith.constant 0 : i32
    %c0_i32_1 = arith.constant 0 : i32
    return %c0_i32, %c0_i32_0 : i32, i32
  }
  func.func @transform_2(%arg0: i32, %arg1: i32) -> (i32, i32) {
    %c0_i32 = arith.constant 0 : i32
    %c0_i32_0 = arith.constant 0 : i32
    %c0_i32_1 = arith.constant 0 : i32
    return %c0_i32, %c0_i32_0 : i32, i32
  }
  func.func @transform_3(%arg0: i32, %arg1: i32) -> (i32, i32, i32) {
    %c0_i32 = arith.constant 0 : i32
    %c0_i32_0 = arith.constant 0 : i32
    return %arg0, %c0_i32, %arg1 : i32, i32, i32
  }
}

</mosaic_0001>

<bundles_post_ra>
// kernel: downblock_forward.3
= control target key start
LH: loop header
LB: loop body
LE: loop exit
PB: predicated region body
PF: predicated region fallthrough
CT: control target
= control target key end

     0   :  { %s446_s12 = smov 0   ;;  %s448_s13 = smov 0   ;;  %s485_s0 = inlined_call_operand.vmem [shape: f32[2,4,256], index: 0, kind: input, shape index: {}]   ;;  %s486_s1 = inlined_call_operand.vmem [shape: bf16[4,4], index: 1, kind: input, shape index: {}]   ;;  %s487_s2 = inlined_call_operand.vmem [shape: f32[4,1], index: 2, kind: input, shape index: {}]   ;;  %s488_s3 = inlined_call_operand.vmem [shape: f32[2,4,256], index: 3, kind: output, shape index: {}]  }
   0x1   :  { %s450_s14 = smov 0  }
   0x2 LB: > { %s25_s15 = sadd.s32 1, %s419_s13  ;;  %p364_p0 = scmp.ge.s32.totalorder %s423_s14, 1  ;;  %s423_s14 = sphi %s450_s14, %s13_s14   ;;  %s419_s13 = sphi %s448_s13, %s490_s13   ;;  %s415_s12 = sphi %s446_s12, %s489_s12  }
   0x3   : > { %p27_p1 = scmp.ge.s32.totalorder %s25_s15, 2  ;;  %p158_p2 = scmp.lt.s32.totalorder %s423_s14, 3 }
   0x5   : > { %s492_s15 = smov (%p27_p1, %s25_s15), 0  ;;  %p159_p3 = pnand %p364_p0, %p158_p2 }
   0x6   : > { %p191_p4 = scmp.lt.s32.totalorder (!%p159_p3), %s415_s12, 1 }
   0x7   : > { %162 = sbr.rel (%p159_p3) target bundleno = 164 (0xa4), region = 32 }
   0xc   : > { %v425_v0 = vmov 0   ;;  %v221_v1 = vld [vmem:[%s487_s2] sm:$0xf]  ;;  %s494_s12 = smov (!%p191_p4, %s415_s12), 1  ;;  %vm231_vm0 = vcmask 1041408   ;;  %vm227_vm1 = vcmask 31744  }
   0xd   : > { %400 = vset.pattern.permute.xlu0 %v425_v0  ;;  %s373_s18 = sshll.u32 %s494_s12, 3  ;;  %v220_v9 = vld [vmem:[%s486_s1] sm:$0x3]  ;;  %vm269_vm2 = vcmask 1043456  }
   0xe   : > { %224 = vperm.xlu0 %400, %v221_v1   ;;  %s198_s21 = scalar_lea.vmem %s485_s0, %s373_s18  ;;  %s208_s26 = scalar_lea.vmem %s488_s3, %s373_s18 }
   0xf   : > { %v211_v2 = vld [vmem:[%s198_s21] sm:$0xff] }
  0x10   : > { %213 = vst [vmem:[#allocation1] ss:$2 sm:$0xff] %v211_v2 }
  0x17   : > { %v214_v3 = vld.sshfl [vmem:[#allocation1] sm:$0xff pattern:$0x75316420]  ;;  %v215_v4 = vld.sshfl [vmem:[#allocation1 + $0x8] sm:$0xff pattern:$0x75316420] }
  0x18   : > { %v218_v5 = vpack.c.bf16 %v214_v3, %v214_v3  ;;  %v219_v6 = vpack.c.bf16 %v215_v4, %v215_v4 }
  0x1a   : > { %v233_v7 = vsel %vm231_vm0, %v218_v5, 0  ;;  %v236_v8 = vsel %vm231_vm0, %v219_v6, 0 }
  0x1b   : > { %245 = vmatpush.bf16.msra.mxu0 %v233_v7  ;;  %258 = vmatpush.bf16.msra.mxu1 %v236_v8 }
  0x1e   : > { %369 = vmatmul.msk.bf16.vlgmr.msra.gmra.mxu0 %vm227_vm1, %v220_v9  ;;  %370 = vmatmul.msk.bf16.vlgmr.msra.gmra.mxu1 %vm227_vm1, %v220_v9 }
  0x80   : > { %v225_v10 = vpop.permute.xlu0 %224 }
  0x9b   : > { %v247_v11 = vpop.f32.mrf.mxu0  ;;  %v260_v12 = vpop.f32.mrf.mxu1 }
  0x9c   : > { %v248_v13 = vadd.f32 %v247_v11, %v225_v10  ;;  %v261_v14 = vadd.f32 %v260_v12, %v225_v10 }
  0x9e   : > { %v265_v15 = vmax.f32 %v261_v14, 0.0  ;;  %v264_v16 = vmax.f32 %v248_v13, 0.0 }
  0xa0   : > { %v268_v17 = vrot.slane %v265_v15, 4 }
  0xa2   : > { %v270_v18 = vsel %vm269_vm2, %v264_v16, %v268_v17 }
  0xa3   : > { %272 = vst [vmem:[%s208_s26] sm:$0xff] %v270_v18  ;;  %v249_v19 = vpop.f32.mrf.mxu0  ;;  %v262_v20 = vpop.f32.mrf.mxu1 }
  0xa4 PF: > { %s13_s14 = sadd.s32 1, %s423_s14   ;;  %s489_s12 = smov %s419_s13 }
  0xa5   : > { %p10_p5 = scmp.ge.s32.totalorder %s13_s14, 4   ;;  %s490_s13 = smov %s492_s15 }
  0xa7   :  { %12 = sbr.rel (!%p10_p5) target bundleno = 2 (0x2), region = 62 }

// kernel: downblock_forward.4
= control target key start
LH: loop header
LB: loop body
LE: loop exit
PB: predicated region body
PF: predicated region fallthrough
CT: control target
= control target key end

     0   :  { %s1725_s21 = smov 0   ;;  %s2124_s0 = inlined_call_operand.vmem [shape: f32[2,4,16,16], index: 0, kind: input, shape index: {}]   ;;  %s2125_s1 = inlined_call_operand.vmem [shape: f32[2,4,16,16], index: 1, kind: input, shape index: {}]   ;;  %s2126_s2 = inlined_call_operand.vmem [shape: f32[3,4,8,16], index: 2, kind: input, shape index: {}, may-alias: {2,4}]   ;;  %s2127_s3 = inlined_call_operand.vmem [shape: f32[3,4,16,8], index: 3, kind: input, shape index: {}]   ;;  %s2128_s4 = inlined_call_operand.vmem [shape: f32[3,4,8,16], index: 4, kind: input, shape index: {}, may-alias: {2,4}]   ;;  %s2129_s5 = inlined_call_operand.vmem [shape: f32[3,4,16,8], index: 5, kind: input, shape index: {}]   ;;  %s2130_s6 = inlined_call_operand.vmem [shape: f32[2,8,8,8], index: 6, kind: output, shape index: {}]  }
   0x1 LB: > { %s1558_s22 = sadd.s32 4294967295, %s1688_s21   ;;  %p1562_p0 = scmp.ge.s32.totalorder %s1688_s21, 1  ;;  %s1688_s21 = sphi %s1725_s21, %s16_s21  }
   0x2   : > { %p222_p1 = scmp.lt.s32.totalorder %s1688_s21, 3 }
   0x4   : > { %p223_p2 = pnand %p1562_p0, %p222_p1 }
   0x5   : > { %p257_p3 = scmp.lt.s32.totalorder (!%p223_p2), %s1558_s22, 1 }
   0x6   : > { %226 = sbr.rel (%p223_p2) target bundleno = 740 (0x2e4), region = 44 }
   0xb   : > { %s2132_s22 = smov (!%p257_p3, %s1558_s22), 1  ;;  %v280_v3 = vld [vmem:[%s2126_s2] sm:$0xff]  ;;  %vm284_vm0 = vcmask 130048   ;;  %v281_v9 = vld [vmem:[%s2126_s2 + $0x8] sm:$0xff]  ;;  %v282_v10 = vld [vmem:[%s2126_s2 + $0x10] sm:$0xff]  ;;  %vm877_vm1 = vcmask 64512  }
   0xc   : > { %s1733_s23 = sshll.u32 %s2132_s22, 6  ;;  %v283_v11 = vld [vmem:[%s2126_s2 + $0x18] sm:$0xff]  ;;  %v1573_v12 = vld [vmem:[%s2126_s2 + $0x20] sm:$0xff]  ;;  %v1574_v13 = vld [vmem:[%s2126_s2 + $0x28] sm:$0xff] }
   0xd   : > { %s261_s26 = scalar_lea.vmem %s2124_s0, %s1733_s23  ;;  %v1575_v14 = vld [vmem:[%s2126_s2 + $0x30] sm:$0xff]  ;;  %v1576_v15 = vld [vmem:[%s2126_s2 + $0x38] sm:$0xff]  ;;  %v1582_v16 = vld [vmem:[%s2127_s3 + $0x48] sm:$0xff]  ;;  %s266_s27 = scalar_lea.vmem %s2125_s1, %s1733_s23 }
   0xe   : > { %v1739_v0 = vld [vmem:[%s261_s26 + $0x8] sm:$0xff]  ;;  %v1741_v1 = vld [vmem:[%s261_s26 + $0x18] sm:$0xff]  ;;  %v1752_v5 = vld [vmem:[%s261_s26] sm:$0xff]  ;;  %s2027_s10 = scalar_lea.vmem %s2130_s6, %s1733_s23 }
   0xf   : > { %v1743_v2 = vld [vmem:[%s261_s26 + $0x28] sm:$0xff]  ;;  %302 = vmatpush.msra.mxu0 %v1739_v0  ;;  %325 = vmatpush.msra.mxu1 %v1741_v1  ;;  %v1750_v4 = vld [vmem:[%s261_s26 + $0x38] sm:$0xff]  ;;  %v1754_v6 = vld [vmem:[%s261_s26 + $0x10] sm:$0xff] }
  0x10   : > { %348 = vmatpush.msra.mxu2 %v1743_v2  ;;  %371 = vmatpush.msra.mxu3 %v1750_v4  ;;  %v1758_v7 = vld [vmem:[%s261_s26 + $0x20] sm:$0xff]  ;;  %v1760_v8 = vld [vmem:[%s261_s26 + $0x30] sm:$0xff]  ;;  %v1584_v17 = vld [vmem:[%s2127_s3 + $0x58] sm:$0xff] }
  0x11   : > { %303 = vmatpush.msra.mxu0 %v1752_v5  ;;  %326 = vmatpush.msra.mxu1 %v1754_v6  ;;  %v1586_v18 = vld [vmem:[%s2127_s3 + $0x68] sm:$0xff]  ;;  %v1588_v19 = vld [vmem:[%s2127_s3 + $0x78] sm:$0xff]  ;;  %v1581_v20 = vld [vmem:[%s2127_s3 + $0x40] sm:$0xff] }
  0x12   : > { %349 = vmatpush.msra.mxu2 %v1758_v7  ;;  %372 = vmatpush.msra.mxu3 %v1760_v8  ;;  %v1583_v21 = vld [vmem:[%s2127_s3 + $0x50] sm:$0xff]  ;;  %v1585_v22 = vld [vmem:[%s2127_s3 + $0x60] sm:$0xff]  ;;  %v378_v24 = vld [vmem:[%s2127_s3 + $0x8] sm:$0xff] }
  0x13   : > { %1569 = vmatmul.msk.f32.vlgmr.msra.gmra.mxu0 %vm284_vm0, %v280_v3  ;;  %1570 = vmatmul.msk.f32.vlgmr.msra.gmra.mxu1 %vm284_vm0, %v281_v9  ;;  %v1587_v23 = vld [vmem:[%s2127_s3 + $0x70] sm:$0xff]  ;;  %v380_v25 = vld [vmem:[%s2127_s3 + $0x18] sm:$0xff]  ;;  %v382_v26 = vld [vmem:[%s2127_s3 + $0x28] sm:$0xff] }
  0x14   : > { %1571 = vmatmul.msk.f32.vlgmr.msra.gmra.mxu2 %vm284_vm0, %v282_v10  ;;  %1572 = vmatmul.msk.f32.vlgmr.msra.gmra.mxu3 %vm284_vm0, %v283_v11  ;;  %v384_v27 = vld [vmem:[%s2127_s3 + $0x38] sm:$0xff]  ;;  %v377_v28 = vld [vmem:[%s2127_s3] sm:$0xff]  ;;  %v379_v29 = vld [vmem:[%s2127_s3 + $0x10] sm:$0xff] }
  0x15   : > { %453 = vmatpush.msrb.mxu2 %v1743_v2  ;;  %476 = vmatpush.msrb.mxu3 %v1750_v4  ;;  %v381_v30 = vld [vmem:[%s2127_s3 + $0x20] sm:$0xff]  ;;  %v383_v31 = vld [vmem:[%s2127_s3 + $0x30] sm:$0xff]  ;;  %v1598_v41 = vld [vmem:[%s2126_s2 + $0x48] sm:$0xff] }
  0x16   : > { %407 = vmatpush.msrb.mxu0 %v1739_v0  ;;  %430 = vmatpush.msrb.mxu1 %v1741_v1  ;;  %v1597_v40 = vld [vmem:[%s2126_s2 + $0x40] sm:$0xff]  ;;  %v1599_v42 = vld [vmem:[%s2126_s2 + $0x50] sm:$0xff]  ;;  %v1600_v43 = vld [vmem:[%s2126_s2 + $0x58] sm:$0xff] }
  0x17   : > { %454 = vmatpush.msrb.mxu2 %v1758_v7  ;;  %477 = vmatpush.msrb.mxu3 %v1760_v8  ;;  %v1606_v44 = vld [vmem:[%s2127_s3 + $0x88] sm:$0xff]  ;;  %v1608_v45 = vld [vmem:[%s2127_s3 + $0x98] sm:$0xff]  ;;  %v1605_v46 = vld [vmem:[%s2127_s3 + $0x80] sm:$0xff] }
  0x18   : > { %408 = vmatpush.msrb.mxu0 %v1752_v5  ;;  %431 = vmatpush.msrb.mxu1 %v1754_v6  ;;  %v1607_v47 = vld [vmem:[%s2127_s3 + $0x90] sm:$0xff]  ;;  %v1610_v48 = vld [vmem:[%s2127_s3 + $0xa8] sm:$0xff]  ;;  %v1612_v49 = vld [vmem:[%s2127_s3 + $0xb8] sm:$0xff] }
  0x19   : > { %554 = vmatpush.msra.mxu2 %v1586_v18  ;;  %577 = vmatpush.msra.mxu3 %v1588_v19  ;;  %v1905_v50 = vld [vmem:[%s266_s27 + $0x8] sm:$0xff]  ;;  %v1907_v51 = vld [vmem:[%s266_s27 + $0x18] sm:$0xff]  ;;  %v1909_v52 = vld [vmem:[%s266_s27] sm:$0xff] }
  0x1a   : > { %508 = vmatpush.msra.mxu0 %v1582_v16  ;;  %531 = vmatpush.msra.mxu1 %v1584_v17  ;;  %v1911_v53 = vld [vmem:[%s266_s27 + $0x10] sm:$0xff]  ;;  %v1609_v54 = vld [vmem:[%s2127_s3 + $0xa0] sm:$0xff]  ;;  %v1923_v56 = vld [vmem:[%s266_s27 + $0x28] sm:$0xff] }
  0x1b   : > { %1577 = vmatmul.msk.f32.vlgmr.msrb.gmra.mxu0 %vm284_vm0, %v1573_v12  ;;  %1578 = vmatmul.msk.f32.vlgmr.msrb.gmra.mxu1 %vm284_vm0, %v1574_v13  ;;  %v1611_v55 = vld [vmem:[%s2127_s3 + $0xb0] sm:$0xff]  ;;  %v1925_v57 = vld [vmem:[%s266_s27 + $0x38] sm:$0xff]  ;;  %v1927_v58 = vld [vmem:[%s266_s27 + $0x20] sm:$0xff] }
  0x1c   : > { %1579 = vmatmul.msk.f32.vlgmr.msrb.gmra.mxu2 %vm284_vm0, %v1575_v14  ;;  %1580 = vmatmul.msk.f32.vlgmr.msrb.gmra.mxu3 %vm284_vm0, %v1576_v15  ;;  %v1931_v59 = vld [vmem:[%s266_s27 + $0x30] sm:$0xff]  ;;  %v890_v10 = vld [vmem:[%s2128_s4] sm:$0xff]  ;;  %v891_v11 = vld [vmem:[%s2128_s4 + $0x8] sm:$0xff] }
  0x1d   : > { %509 = vmatpush.msra.mxu0 %v1581_v20  ;;  %532 = vmatpush.msra.mxu1 %v1583_v21  ;;  %v1621_v14 = vld [vmem:[%s2128_s4 + $0x20] sm:$0xff]  ;;  %v1622_v15 = vld [vmem:[%s2128_s4 + $0x28] sm:$0xff]  ;;  %v892_v16 = vld [vmem:[%s2128_s4 + $0x10] sm:$0xff] }
  0x1e   : > { %555 = vmatpush.msra.mxu2 %v1585_v22  ;;  %578 = vmatpush.msra.mxu3 %v1587_v23  ;;  %v893_v17 = vld [vmem:[%s2128_s4 + $0x18] sm:$0xff]  ;;  %v1623_v18 = vld [vmem:[%s2128_s4 + $0x30] sm:$0xff]  ;;  %v1630_v20 = vld [vmem:[%s2129_s5 + $0x48] sm:$0xff] }
  0x1f   : > { %600 = vmatpush.msrb.mxu0 %v378_v24  ;;  %623 = vmatpush.msrb.mxu1 %v380_v25  ;;  %v1624_v19 = vld [vmem:[%s2128_s4 + $0x38] sm:$0xff]  ;;  %v1629_v22 = vld [vmem:[%s2129_s5 + $0x40] sm:$0xff]  ;;  %v1631_v23 = vld [vmem:[%s2129_s5 + $0x50] sm:$0xff] }
  0x20   : > { %646 = vmatpush.msrb.mxu2 %v382_v26  ;;  %669 = vmatpush.msrb.mxu3 %v384_v27  ;;  %v1632_v21 = vld [vmem:[%s2129_s5 + $0x58] sm:$0xff]  ;;  %v987_v24 = vld [vmem:[%s2129_s5 + $0x8] sm:$0xff]  ;;  %v986_v26 = vld [vmem:[%s2129_s5] sm:$0xff] }
  0x21   : > { %601 = vmatpush.msrb.mxu0 %v377_v28  ;;  %624 = vmatpush.msrb.mxu1 %v379_v29  ;;  %v989_v25 = vld [vmem:[%s2129_s5 + $0x18] sm:$0xff]  ;;  %v988_v27 = vld [vmem:[%s2129_s5 + $0x10] sm:$0xff]  ;;  %v1634_v28 = vld [vmem:[%s2129_s5 + $0x68] sm:$0xff] }
  0x22   : > { %647 = vmatpush.msrb.mxu2 %v381_v30  ;;  %670 = vmatpush.msrb.mxu3 %v383_v31  ;;  %v1636_v29 = vld [vmem:[%s2129_s5 + $0x78] sm:$0xff]  ;;  %v1633_v30 = vld [vmem:[%s2129_s5 + $0x60] sm:$0xff]  ;;  %v1635_v31 = vld [vmem:[%s2129_s5 + $0x70] sm:$0xff] }
  0x90   : > { %v305_v32 = vpop.f32.mrf.mxu0  ;;  %v328_v33 = vpop.f32.mrf.mxu1 }
  0x97   : > { %v351_v34 = vpop.f32.mrf.mxu2  ;;  %v374_v35 = vpop.f32.mrf.mxu3 }
  0x98   : > { %v410_v36 = vpop.f32.mrf.mxu0  ;;  %v433_v37 = vpop.f32.mrf.mxu1 }
  0x99   : > { %1589 = vmatmul.msk.f32.vlgmr.msra.gmra.mxu0 %vm284_vm0, %v410_v36  ;;  %1590 = vmatmul.msk.f32.vlgmr.msra.gmra.mxu1 %vm284_vm0, %v433_v37  ;;  %v991_v36 = vld [vmem:[%s2129_s5 + $0x28] sm:$0xff]  ;;  %v993_v37 = vld [vmem:[%s2129_s5 + $0x38] sm:$0xff] }
  0x9a   : > { %697 = vmatpush.msra.mxu0 %v1739_v0  ;;  %720 = vmatpush.msra.mxu1 %v1741_v1 }
  0x9c   : > { %698 = vmatpush.msra.mxu0 %v1752_v5  ;;  %721 = vmatpush.msra.mxu1 %v1754_v6 }
  0x9f   : > { %v456_v38 = vpop.f32.mrf.mxu2  ;;  %v479_v39 = vpop.f32.mrf.mxu3 }
  0xa0   : > { %1591 = vmatmul.msk.f32.vlgmr.msra.gmra.mxu2 %vm284_vm0, %v456_v38  ;;  %1592 = vmatmul.msk.f32.vlgmr.msra.gmra.mxu3 %vm284_vm0, %v479_v39  ;;  %v990_v38 = vld [vmem:[%s2129_s5 + $0x20] sm:$0xff]  ;;  %v992_v39 = vld [vmem:[%s2129_s5 + $0x30] sm:$0xff] }
  0xa1   : > { %1593 = vmatmul.msk.f32.vlgmr.msrb.gmra.mxu0 %vm284_vm0, %v305_v32  ;;  %1594 = vmatmul.msk.f32.vlgmr.msrb.gmra.mxu1 %vm284_vm0, %v328_v33 }
  0xa2   : > { %743 = vmatpush.msra.mxu2 %v1743_v2  ;;  %766 = vmatpush.msra.mxu3 %v1750_v4 }
  0xa3   : > { %798 = vmatpush.msrb.mxu0 %v1606_v44  ;;  %821 = vmatpush.msrb.mxu1 %v1608_v45 }
  0xa4   : > { %744 = vmatpush.msra.mxu2 %v1758_v7  ;;  %767 = vmatpush.msra.mxu3 %v1760_v8 }
  0xa5   : > { %799 = vmatpush.msrb.mxu0 %v1605_v46  ;;  %822 = vmatpush.msrb.mxu1 %v1607_v47 }
  0xa8   : > { %1595 = vmatmul.msk.f32.vlgmr.msrb.gmra.mxu2 %vm284_vm0, %v351_v34  ;;  %1596 = vmatmul.msk.f32.vlgmr.msrb.gmra.mxu3 %vm284_vm0, %v374_v35 }
  0xa9   : > { %1601 = vmatmul.msk.f32.vlgmr.msra.gmra.mxu0 %vm284_vm0, %v1597_v40  ;;  %1602 = vmatmul.msk.f32.vlgmr.msra.gmra.mxu1 %vm284_vm0, %v1598_v41 }
  0xaa   : > { %844 = vmatpush.msrb.mxu2 %v1610_v48  ;;  %867 = vmatpush.msrb.mxu3 %v1612_v49 }
  0xab   : > { %911 = vmatpush.msra.mxu0 %v1905_v50  ;;  %934 = vmatpush.msra.mxu1 %v1907_v51 }
  0xac   : > { %845 = vmatpush.msrb.mxu2 %v1609_v54  ;;  %868 = vmatpush.msrb.mxu3 %v1611_v55  ;;  %v1647_v54 = vld [vmem:[%s2128_s4 + $0x50] sm:$0xff]  ;;  %v1648_v55 = vld [vmem:[%s2128_s4 + $0x58] sm:$0xff] }
  0xad   : > { %912 = vmatpush.msra.mxu0 %v1909_v52  ;;  %935 = vmatpush.msra.mxu1 %v1911_v53 }
  0xb0   : > { %1603 = vmatmul.msk.f32.vlgmr.msra.gmra.mxu2 %vm284_vm0, %v1599_v42  ;;  %1604 = vmatmul.msk.f32.vlgmr.msra.gmra.mxu3 %vm284_vm0, %v1600_v43 }
  0xb1   : > { %957 = vmatpush.msra.mxu2 %v1923_v56  ;;  %980 = vmatpush.msra.mxu3 %v1925_v57 }
  0xb3   : > { %958 = vmatpush.msra.mxu2 %v1927_v58  ;;  %981 = vmatpush.msra.mxu3 %v1931_v59 }
 0x116   : > { %v511_v60 = vpop.f32.mrf.mxu0  ;;  %v534_v61 = vpop.f32.mrf.mxu1 }
 0x11e   : > { %v603_v62 = vpop.f32.mrf.mxu0  ;;  %v626_v63 = vpop.f32.mrf.mxu1 }
 0x11f   : > { %v1935_v0 = vadd.f32 %v603_v62, %v511_v60  ;;  %v1937_v1 = vadd.f32 %v626_v63, %v534_v61  ;;  %v1658_v62 = vld [vmem:[%s2129_s5 + $0xa8] sm:$0xff]  ;;  %v1660_v63 = vld [vmem:[%s2129_s5 + $0xb8] sm:$0xff] }
 0x123   : > { %v557_v2 = vpop.f32.mrf.mxu2  ;;  %v580_v3 = vpop.f32.mrf.mxu3 }
 0x126   : > { %v700_v4 = vpop.f32.mrf.mxu0  ;;  %v723_v5 = vpop.f32.mrf.mxu1 }
 0x127   : > { %1613 = vmatmul.msk.f32.vlgmr.msrb.gmra.mxu0 %vm284_vm0, %v700_v4  ;;  %1614 = vmatmul.msk.f32.vlgmr.msrb.gmra.mxu1 %vm284_vm0, %v723_v5 }
 0x128   : > { %1016 = vmatpush.msrb.mxu0 %v1905_v50  ;;  %1039 = vmatpush.msrb.mxu1 %v1907_v51 }
 0x12a   : > { %1017 = vmatpush.msrb.mxu0 %v1909_v52  ;;  %1040 = vmatpush.msrb.mxu1 %v1911_v53 }
 0x12b   : > { %v649_v6 = vpop.f32.mrf.mxu2  ;;  %v672_v7 = vpop.f32.mrf.mxu3 }
 0x12c   : > { %v1945_v8 = vadd.f32 %v649_v6, %v557_v2  ;;  %v1947_v9 = vadd.f32 %v672_v7, %v580_v3 }
 0x12f   : > { %1617 = vmatmul.msk.f32.vlgmr.msra.gmra.mxu0 %vm284_vm0, %v890_v10  ;;  %1618 = vmatmul.msk.f32.vlgmr.msra.gmra.mxu1 %vm284_vm0, %v891_v11 }
 0x130   : > { %1117 = vmatpush.msra.mxu0 %v1630_v20  ;;  %1140 = vmatpush.msra.mxu1 %v1632_v21 }
 0x132   : > { %1118 = vmatpush.msra.mxu0 %v1629_v22  ;;  %1141 = vmatpush.msra.mxu1 %v1631_v23 }
 0x133   : > { %v746_v12 = vpop.f32.mrf.mxu2  ;;  %v769_v13 = vpop.f32.mrf.mxu3 }
 0x134   : > { %1615 = vmatmul.msk.f32.vlgmr.msrb.gmra.mxu2 %vm284_vm0, %v746_v12  ;;  %1616 = vmatmul.msk.f32.vlgmr.msrb.gmra.mxu3 %vm284_vm0, %v769_v13 }
 0x135   : > { %1062 = vmatpush.msrb.mxu2 %v1923_v56  ;;  %1085 = vmatpush.msrb.mxu3 %v1925_v57 }
 0x137   : > { %1625 = vmatmul.msk.f32.vlgmr.msrb.gmra.mxu0 %vm284_vm0, %v1621_v14  ;;  %1626 = vmatmul.msk.f32.vlgmr.msrb.gmra.mxu1 %vm284_vm0, %v1622_v15 }
 0x138   : > { %1063 = vmatpush.msrb.mxu2 %v1927_v58  ;;  %1086 = vmatpush.msrb.mxu3 %v1931_v59 }
 0x139   : > { %1209 = vmatpush.msrb.mxu0 %v987_v24  ;;  %1232 = vmatpush.msrb.mxu1 %v989_v25 }
 0x13b   : > { %1210 = vmatpush.msrb.mxu0 %v986_v26  ;;  %1233 = vmatpush.msrb.mxu1 %v988_v27 }
 0x13c   : > { %1619 = vmatmul.msk.f32.vlgmr.msra.gmra.mxu2 %vm284_vm0, %v892_v16  ;;  %1620 = vmatmul.msk.f32.vlgmr.msra.gmra.mxu3 %vm284_vm0, %v893_v17 }
 0x13d   : > { %1163 = vmatpush.msra.mxu2 %v1634_v28  ;;  %1186 = vmatpush.msra.mxu3 %v1636_v29 }
 0x13f   : > { %1164 = vmatpush.msra.mxu2 %v1633_v30  ;;  %1187 = vmatpush.msra.mxu3 %v1635_v31 }
 0x144   : > { %1627 = vmatmul.msk.f32.vlgmr.msrb.gmra.mxu2 %vm284_vm0, %v1623_v18  ;;  %1628 = vmatmul.msk.f32.vlgmr.msrb.gmra.mxu3 %vm284_vm0, %v1624_v19 }
 0x145   : > { %1255 = vmatpush.msrb.mxu2 %v991_v36  ;;  %1278 = vmatpush.msrb.mxu3 %v993_v37 }
 0x147   : > { %1256 = vmatpush.msrb.mxu2 %v990_v38  ;;  %1279 = vmatpush.msrb.mxu3 %v992_v39 }
 0x1a4   : > { %v801_v32 = vpop.f32.mrf.mxu0  ;;  %v824_v33 = vpop.f32.mrf.mxu1 }
 0x1a5   : > { %v873_v34 = vadd.f32 %v801_v32, %v1935_v0  ;;  %v874_v35 = vadd.f32 %v824_v33, %v1937_v1  ;;  %v1657_v0 = vld [vmem:[%s2129_s5 + $0xa0] sm:$0xff]  ;;  %v1659_v1 = vld [vmem:[%s2129_s5 + $0xb0] sm:$0xff] }
 0x1a7   : > { %878 = vst.msk [vmem:[%s2027_s10] sm:$0xff] %vm877_vm1, %v873_v34 }
 0x1a8   : > { %879 = vst.msk [vmem:[%s2027_s10 + $0x8] sm:$0xff] %vm877_vm1, %v874_v35 }
 0x1ac   : > { %v914_v40 = vpop.f32.mrf.mxu0  ;;  %v937_v41 = vpop.f32.mrf.mxu1 }
 0x1b4   : > { %v1019_v42 = vpop.f32.mrf.mxu0  ;;  %v1042_v43 = vpop.f32.mrf.mxu1 }
 0x1b5   : > { %1637 = vmatmul.msk.f32.vlgmr.msra.gmra.mxu0 %vm284_vm0, %v1019_v42  ;;  %1638 = vmatmul.msk.f32.vlgmr.msra.gmra.mxu1 %vm284_vm0, %v1042_v43 }
 0x1b6   : > { %1306 = vmatpush.msra.mxu0 %v1905_v50  ;;  %1329 = vmatpush.msra.mxu1 %v1907_v51  ;;  %v1645_v50 = vld [vmem:[%s2128_s4 + $0x40] sm:$0xff]  ;;  %v1646_v51 = vld [vmem:[%s2128_s4 + $0x48] sm:$0xff] }
 0x1b7   : > { %v847_v44 = vpop.f32.mrf.mxu2  ;;  %v870_v45 = vpop.f32.mrf.mxu3 }
 0x1b8   : > { %v875_v46 = vadd.f32 %v847_v44, %v1945_v8  ;;  %v876_v47 = vadd.f32 %v870_v45, %v1947_v9  ;;  %1307 = vmatpush.msra.mxu0 %v1909_v52  ;;  %1330 = vmatpush.msra.mxu1 %v1911_v53 }
 0x1ba   : > { %880 = vst.msk [vmem:[%s2027_s10 + $0x10] sm:$0xff] %vm877_vm1, %v875_v46 }
 0x1bb   : > { %881 = vst.msk [vmem:[%s2027_s10 + $0x18] sm:$0xff] %vm877_vm1, %v876_v47 }
 0x1bd   : > { %1641 = vmatmul.msk.f32.vlgmr.msrb.gmra.mxu0 %vm284_vm0, %v914_v40  ;;  %1642 = vmatmul.msk.f32.vlgmr.msrb.gmra.mxu1 %vm284_vm0, %v937_v41 }
 0x1bf   : > { %v960_v48 = vpop.f32.mrf.mxu2  ;;  %v983_v49 = vpop.f32.mrf.mxu3 }
 0x1c5   : > { %1649 = vmatmul.msk.f32.vlgmr.msra.gmra.mxu0 %vm284_vm0, %v1645_v50  ;;  %1650 = vmatmul.msk.f32.vlgmr.msra.gmra.mxu1 %vm284_vm0, %v1646_v51 }
 0x1c7   : > { %v1065_v52 = vpop.f32.mrf.mxu2  ;;  %v1088_v53 = vpop.f32.mrf.mxu3 }
 0x1c8   : > { %1639 = vmatmul.msk.f32.vlgmr.msra.gmra.mxu2 %vm284_vm0, %v1065_v52  ;;  %1640 = vmatmul.msk.f32.vlgmr.msra.gmra.mxu3 %vm284_vm0, %v1088_v53 }
 0x1c9   : > { %1352 = vmatpush.msra.mxu2 %v1923_v56  ;;  %1375 = vmatpush.msra.mxu3 %v1925_v57  ;;  %v1654_v56 = vld [vmem:[%s2129_s5 + $0x88] sm:$0xff]  ;;  %v1656_v57 = vld [vmem:[%s2129_s5 + $0x98] sm:$0xff] }
 0x1ca   : > { %1407 = vmatpush.msrb.mxu0 %v1654_v56  ;;  %1430 = vmatpush.msrb.mxu1 %v1656_v57 }
 0x1cb   : > { %1353 = vmatpush.msra.mxu2 %v1927_v58  ;;  %1376 = vmatpush.msra.mxu3 %v1931_v59  ;;  %v1653_v58 = vld [vmem:[%s2129_s5 + $0x80] sm:$0xff]  ;;  %v1655_v59 = vld [vmem:[%s2129_s5 + $0x90] sm:$0xff] }
 0x1cc   : > { %1408 = vmatpush.msrb.mxu0 %v1653_v58  ;;  %1431 = vmatpush.msrb.mxu1 %v1655_v59 }
 0x1d0   : > { %1643 = vmatmul.msk.f32.vlgmr.msrb.gmra.mxu2 %vm284_vm0, %v960_v48  ;;  %1644 = vmatmul.msk.f32.vlgmr.msrb.gmra.mxu3 %vm284_vm0, %v983_v49 }
 0x1d1   : > { %1453 = vmatpush.msrb.mxu2 %v1658_v62  ;;  %1476 = vmatpush.msrb.mxu3 %v1660_v63 }
 0x1d3   : > { %1454 = vmatpush.msrb.mxu2 %v1657_v0  ;;  %1477 = vmatpush.msrb.mxu3 %v1659_v1 }
 0x1d8   : > { %1651 = vmatmul.msk.f32.vlgmr.msra.gmra.mxu2 %vm284_vm0, %v1647_v54  ;;  %1652 = vmatmul.msk.f32.vlgmr.msra.gmra.mxu3 %vm284_vm0, %v1648_v55 }
 0x232   : > { %v1120_v60 = vpop.f32.mrf.mxu0  ;;  %v1143_v61 = vpop.f32.mrf.mxu1 }
 0x23a   : > { %v1212_v2 = vpop.f32.mrf.mxu0  ;;  %v1235_v3 = vpop.f32.mrf.mxu1 }
 0x23b   : > { %v1213_v4 = vadd.f32 %v1212_v2, %v1120_v60  ;;  %v1236_v5 = vadd.f32 %v1235_v3, %v1143_v61 }
 0x242   : > { %v1309_v6 = vpop.f32.mrf.mxu0  ;;  %v1332_v7 = vpop.f32.mrf.mxu1 }
 0x243   : > { %1661 = vmatmul.msk.f32.vlgmr.msrb.gmra.mxu0 %vm284_vm0, %v1309_v6  ;;  %1662 = vmatmul.msk.f32.vlgmr.msrb.gmra.mxu1 %vm284_vm0, %v1332_v7 }
 0x24b   : > { %v1166_v8 = vpop.f32.mrf.mxu2  ;;  %v1189_v9 = vpop.f32.mrf.mxu3 }
 0x253   : > { %v1258_v10 = vpop.f32.mrf.mxu2  ;;  %v1281_v11 = vpop.f32.mrf.mxu3 }
 0x254   : > { %v1259_v12 = vadd.f32 %v1258_v10, %v1166_v8  ;;  %v1282_v13 = vadd.f32 %v1281_v11, %v1189_v9 }
 0x25b   : > { %v1355_v14 = vpop.f32.mrf.mxu2  ;;  %v1378_v15 = vpop.f32.mrf.mxu3 }
 0x25c   : > { %1663 = vmatmul.msk.f32.vlgmr.msrb.gmra.mxu2 %vm284_vm0, %v1355_v14  ;;  %1664 = vmatmul.msk.f32.vlgmr.msrb.gmra.mxu3 %vm284_vm0, %v1378_v15 }
 0x2c0   : > { %v1410_v16 = vpop.f32.mrf.mxu0  ;;  %v1433_v17 = vpop.f32.mrf.mxu1 }
 0x2c1   : > { %v1482_v18 = vadd.f32 %v1410_v16, %v1213_v4  ;;  %v1483_v19 = vadd.f32 %v1433_v17, %v1236_v5 }
 0x2c3   : > { %1665 = vst.msk [vmem:[%s2027_s10 + $0x20] sm:$0xff] %vm877_vm1, %v1482_v18 }
 0x2c4   : > { %1666 = vst.msk [vmem:[%s2027_s10 + $0x28] sm:$0xff] %vm877_vm1, %v1483_v19 }
 0x2df   : > { %v1456_v20 = vpop.f32.mrf.mxu2  ;;  %v1479_v21 = vpop.f32.mrf.mxu3 }
 0x2e0   : > { %v1484_v22 = vadd.f32 %v1456_v20, %v1259_v12  ;;  %v1485_v23 = vadd.f32 %v1479_v21, %v1282_v13 }
 0x2e2   : > { %1667 = vst.msk [vmem:[%s2027_s10 + $0x30] sm:$0xff] %vm877_vm1, %v1484_v22 }
 0x2e3   : > { %1668 = vst.msk [vmem:[%s2027_s10 + $0x38] sm:$0xff] %vm877_vm1, %v1485_v23 }
 0x2e4 PF: > { %s16_s21 = sadd.s32 1, %s1688_s21  }
 0x2e5   : > { %p13_p4 = scmp.ge.s32.totalorder %s16_s21, 4  }
 0x2e7   :  { %15 = sbr.rel (!%p13_p4) target bundleno = 1 (0x1), region = 86 }

// kernel: downblock_forward.5
= control target key start
LH: loop header
LB: loop body
LE: loop exit
PB: predicated region body
PF: predicated region fallthrough
CT: control target
= control target key end

     0   :  { %s386_s12 = smov 0   ;;  %s388_s13 = smov 0   ;;  %s425_s0 = inlined_call_operand.vmem [shape: f32[2,8,64], index: 0, kind: input, shape index: {}]   ;;  %s426_s1 = inlined_call_operand.vmem [shape: bf16[8,8], index: 1, kind: input, shape index: {}]   ;;  %s427_s2 = inlined_call_operand.vmem [shape: f32[8,1], index: 2, kind: input, shape index: {}]   ;;  %s428_s3 = inlined_call_operand.vmem [shape: f32[2,8,64], index: 3, kind: output, shape index: {}]  }
   0x1   :  { %s390_s14 = smov 0  }
   0x2 LB: > { %s25_s15 = sadd.s32 1, %s359_s13  ;;  %p309_p0 = scmp.ge.s32.totalorder %s363_s14, 1  ;;  %s363_s14 = sphi %s390_s14, %s13_s14   ;;  %s359_s13 = sphi %s388_s13, %s430_s13   ;;  %s355_s12 = sphi %s386_s12, %s429_s12  }
   0x3   : > { %p27_p1 = scmp.ge.s32.totalorder %s25_s15, 2  ;;  %p155_p2 = scmp.lt.s32.totalorder %s363_s14, 3 }
   0x5   : > { %s432_s15 = smov (%p27_p1, %s25_s15), 0  ;;  %p156_p3 = pnand %p309_p0, %p155_p2 }
   0x6   : > { %p183_p4 = scmp.lt.s32.totalorder (!%p156_p3), %s355_s12, 1 }
   0x7   : > { %159 = sbr.rel (%p156_p3) target bundleno = 156 (0x9c), region = 32 }
   0xc   : > { %v365_v0 = vmov 0   ;;  %v201_v1 = vld [vmem:[%s427_s2] sm:$0xff]  ;;  %s434_s12 = smov (!%p183_p4, %s355_s12), 1  ;;  %vm211_vm0 = vcmask 1043456   ;;  %vm207_vm1 = vcmask 64512   ;;  %vm229_vm2 = vcmask 523264  }
   0xd   : > { %340 = vset.pattern.permute.xlu0 %v365_v0  ;;  %s310_s18 = sshll.u32 %s434_s12, 3  ;;  %v200_v5 = vld [vmem:[%s426_s1] sm:$0xf] }
   0xe   : > { %204 = vperm.xlu0 %340, %v201_v1   ;;  %s189_s21 = scalar_lea.vmem %s425_s0, %s310_s18  ;;  %s196_s26 = scalar_lea.vmem %s428_s3, %s310_s18 }
   0xf   : > { %v198_v2 = vld [vmem:[%s189_s21] sm:$0xff] }
  0x10   : > { %v199_v3 = vpack.c.bf16 %v198_v2, %v198_v2 }
  0x12   : > { %v213_v4 = vsel %vm211_vm0, %v199_v3, 0 }
  0x13   : > { %222 = vmatpush.bf16.msra.mxu0 %v213_v4 }
  0x16   : > { %312 = vmatmul.msk.bf16.vlgmr.msra.gmra.mxu0 %vm207_vm1, %v200_v5 }
  0x80   : > { %v205_v6 = vpop.permute.xlu0 %204 }
  0x93   : > { %v224_v7 = vpop.f32.mrf.mxu0 }
  0x94   : > { %v225_v8 = vadd.f32 %v224_v7, %v205_v6 }
  0x96   : > { %v228_v9 = vmax.f32 %v225_v8, 0.0 }
  0x98   : > { %230 = vst.msk [vmem:[%s196_s26] sm:$0xff] %vm229_vm2, %v228_v9 }
  0x9b   : > { %v226_v10 = vpop.f32.mrf.mxu0 }
  0x9c PF: > { %s13_s14 = sadd.s32 1, %s363_s14   ;;  %s429_s12 = smov %s359_s13 }
  0x9d   : > { %p10_p5 = scmp.ge.s32.totalorder %s13_s14, 4   ;;  %s430_s13 = smov %s432_s15 }
  0x9f   :  { %12 = sbr.rel (!%p10_p5) target bundleno = 2 (0x2), region = 62 }

</bundles_post_ra>
